<compile_context>
chip_gen: v6e
topology: v6e:2x2x1
jax: 0.10.0
libtpu: 0.0.40
codegen_flags: <defaults>
</compile_context>

<pallas_src>
import functools
import math

import jax
import jax.numpy as jnp
from jax.experimental import pallas as pl
from jax.experimental.pallas import tpu as pltpu

# Set to jnp.bfloat16 on v6e/v7x for ~2x MXU throughput + halved HBM/VMEM traffic
# (matmul accumulation stays f32 via preferred_element_type; layernorm/softmax stay f32).
COMPUTE_DTYPE = jnp.float32

# Explicit scoped-VMEM request; leaves headroom under v7x's 64 MiB physical VMEM.
_VMEM_LIMIT_BYTES = 48 * 1024 * 1024

# Row tile over the flattened B*T dimension (~512-row tiles hit the measured HBM
# roofline sweet spot; clipped to M for small inputs).
_ROW_TILE = 512

# Annotated-transformer-style LayerNorm epsilon.
# TODO(synk): reference LayerNorm class not provided; PyTorch nn.LayerNorm default is 1e-5.
_LN_EPS = 1e-6


def _compiler_params():
    return pltpu.CompilerParams(
        dimension_semantics=("parallel",),
        vmem_limit_bytes=_VMEM_LIMIT_BYTES,
    )


# ----------------------------- Pallas kernels ------------------------------


def _linear_kernel(x_ref, w_ref, b_ref, o_ref, *, compute_dtype):
    x = x_ref[...].astype(compute_dtype)
    w = w_ref[...].astype(compute_dtype)
    o_ref[...] = jnp.dot(x, w, preferred_element_type=jnp.float32) + b_ref[...]


def linear(x, w, b, *, compute_dtype=COMPUTE_DTYPE):
    """y = x @ w + b.  Gridded (parallel) over row tiles of x; weights stay resident."""
    m, d = x.shape
    o = w.shape[1]
    tm = min(_ROW_TILE, m)
    return pl.pallas_call(
        functools.partial(_linear_kernel, compute_dtype=compute_dtype),
        out_shape=jax.ShapeDtypeStruct((m, o), jnp.float32),
        grid=(pl.cdiv(m, tm),),
        in_specs=[
            pl.BlockSpec((tm, d), lambda i: (i, 0)),
            pl.BlockSpec((d, o), lambda i: (0, 0)),
            pl.BlockSpec((1, o), lambda i: (0, 0)),
        ],
        out_specs=pl.BlockSpec((tm, o), lambda i: (i, 0)),
        compiler_params=_compiler_params(),
        cost_estimate=pl.CostEstimate(
            flops=2 * m * d * o,
            transcendentals=0,
            bytes_accessed=4 * (m * d + d * o + m * o + o)),
    )(x, w, b)


def _proj_residual_ln_kernel(a_ref, w_ref, b_ref, r_ref, g_ref, bb_ref, o_ref,
                             *, eps, compute_dtype):
    a = a_ref[...].astype(compute_dtype)
    w = w_ref[...].astype(compute_dtype)
    y = jnp.dot(a, w, preferred_element_type=jnp.float32) + b_ref[...]
    y = y + r_ref[...]                                    # residual add (fused epilogue)
    mean = jnp.mean(y, axis=-1, keepdims=True)
    var = jnp.mean(jnp.square(y - mean), axis=-1, keepdims=True)
    o_ref[...] = (y - mean) * jax.lax.rsqrt(var + eps) * g_ref[...] + bb_ref[...]


def proj_residual_layernorm(a, w, b, resid, gamma, beta, *,
                            eps=_LN_EPS, compute_dtype=COMPUTE_DTYPE):
    """LayerNorm(resid + (a @ w + b)) — fused output projection + residual + LN."""
    m, k = a.shape
    d = w.shape[1]
    tm = min(_ROW_TILE, m)
    return pl.pallas_call(
        functools.partial(_proj_residual_ln_kernel, eps=eps,
                          compute_dtype=compute_dtype),
        out_shape=jax.ShapeDtypeStruct((m, d), jnp.float32),
        grid=(pl.cdiv(m, tm),),
        in_specs=[
            pl.BlockSpec((tm, k), lambda i: (i, 0)),
            pl.BlockSpec((k, d), lambda i: (0, 0)),
            pl.BlockSpec((1, d), lambda i: (0, 0)),
            pl.BlockSpec((tm, d), lambda i: (i, 0)),
            pl.BlockSpec((1, d), lambda i: (0, 0)),
            pl.BlockSpec((1, d), lambda i: (0, 0)),
        ],
        out_specs=pl.BlockSpec((tm, d), lambda i: (i, 0)),
        compiler_params=_compiler_params(),
        cost_estimate=pl.CostEstimate(
            flops=2 * m * k * d + 8 * m * d,
            transcendentals=0,
            bytes_accessed=4 * (m * k + k * d + 2 * m * d + 3 * d)),
    )(a, w, b, resid, gamma, beta)


# TODO(synk): at production sizes (e.g. D=4096, d_ff=16384 f32) w1 + w2 exceed v7x's
# 64 MiB VMEM — add a K-reduction grid axis over d_ff with an f32 accumulator scratch
# (pl.when init/finalize) and/or keep the weights in bf16.
def _ffn_residual_ln_kernel(x_ref, w1_ref, b1_ref, w2_ref, b2_ref, g_ref, bb_ref,
                            o_ref, *, eps, compute_dtype):
    x = x_ref[...]
    h = jnp.dot(x.astype(compute_dtype), w1_ref[...].astype(compute_dtype),
                preferred_element_type=jnp.float32) + b1_ref[...]
    h = jnp.maximum(h, 0.0)                               # ReLU
    y = jnp.dot(h.astype(compute_dtype), w2_ref[...].astype(compute_dtype),
                preferred_element_type=jnp.float32) + b2_ref[...]
    y = y + x                                             # residual add (fused epilogue)
    mean = jnp.mean(y, axis=-1, keepdims=True)
    var = jnp.mean(jnp.square(y - mean), axis=-1, keepdims=True)
    o_ref[...] = (y - mean) * jax.lax.rsqrt(var + eps) * g_ref[...] + bb_ref[...]


def ffn_residual_layernorm(x, w1, b1, w2, b2, gamma, beta, *,
                           eps=_LN_EPS, compute_dtype=COMPUTE_DTYPE):
    """LayerNorm(x + W2 relu(W1 x + b1) + b2) — fully fused point-wise FC sublayer."""
    m, d = x.shape
    dff = w1.shape[1]
    tm = min(_ROW_TILE, m)
    return pl.pallas_call(
        functools.partial(_ffn_residual_ln_kernel, eps=eps,
                          compute_dtype=compute_dtype),
        out_shape=jax.ShapeDtypeStruct((m, d), jnp.float32),
        grid=(pl.cdiv(m, tm),),
        in_specs=[
            pl.BlockSpec((tm, d), lambda i: (i, 0)),
            pl.BlockSpec((d, dff), lambda i: (0, 0)),
            pl.BlockSpec((1, dff), lambda i: (0, 0)),
            pl.BlockSpec((dff, d), lambda i: (0, 0)),
            pl.BlockSpec((1, d), lambda i: (0, 0)),
            pl.BlockSpec((1, d), lambda i: (0, 0)),
            pl.BlockSpec((1, d), lambda i: (0, 0)),
        ],
        out_specs=pl.BlockSpec((tm, d), lambda i: (i, 0)),
        compiler_params=_compiler_params(),
        cost_estimate=pl.CostEstimate(
            flops=4 * m * d * dff + 10 * m * d,
            transcendentals=0,
            bytes_accessed=4 * (2 * m * d + 2 * d * dff + dff + 3 * d)),
    )(x, w1, b1, w2, b2, gamma, beta)


def _attn_core(q2d, kv2d, mask, *, num_heads, d_k, d_v, compute_dtype):
    """All-heads attention for one batch element.

    q2d: (Tq, H*dk)   kv2d: (Tk, H*(dk+dv))   mask: (Tq, Tk) float (1=keep, 0=mask).
    Returns a lane-dense (Tq, H*dv) slab.
    """
    scale = 1.0 / math.sqrt(d_k)
    k2d = kv2d[:, : num_heads * d_k]
    v2d = kv2d[:, num_heads * d_k:]
    keep = mask > 0.0
    outs = []
    for h in range(num_heads):                            # static unroll over heads
        qh = q2d[:, h * d_k:(h + 1) * d_k].astype(compute_dtype)
        kh = k2d[:, h * d_k:(h + 1) * d_k].astype(compute_dtype)
        vh = v2d[:, h * d_v:(h + 1) * d_v].astype(compute_dtype)
        s = jnp.dot(qh, kh.T, preferred_element_type=jnp.float32) * scale
        s = jnp.where(keep, s, -1e9)
        s = s - jnp.max(s, axis=-1, keepdims=True)
        p = jnp.exp(s)
        p = p * pl.reciprocal(jnp.sum(p, axis=-1, keepdims=True), approx=True)
        outs.append(jnp.dot(p.astype(compute_dtype), vh,
                            preferred_element_type=jnp.float32))
    return jnp.concatenate(outs, axis=-1)


def _self_attn_kernel(qkv_ref, m_ref, o_ref, *, num_heads, d_k, d_v, compute_dtype):
    qkv = qkv_ref[0]                                      # (Tq, H*(2dk+dv))
    q2d = qkv[:, : num_heads * d_k]
    kv2d = qkv[:, num_heads * d_k:]
    o_ref[0] = _attn_core(q2d, kv2d, m_ref[0], num_heads=num_heads, d_k=d_k,
                          d_v=d_v, compute_dtype=compute_dtype)


def _cross_attn_kernel(q_ref, kv_ref, m_ref, o_ref, *, num_heads, d_k, d_v,
                       compute_dtype):
    o_ref[0] = _attn_core(q_ref[0], kv_ref[0], m_ref[0], num_heads=num_heads,
                          d_k=d_k, d_v=d_v, compute_dtype=compute_dtype)


def self_attention(qkv, mask, *, num_heads, d_k, d_v, compute_dtype=COMPUTE_DTYPE):
    # qkv: (B, Tq, H*(2dk+dv))   mask: (B, Tq, Tq)
    B, Tq, C = qkv.shape
    Tk = mask.shape[2]
    dv_total = num_heads * d_v
    return pl.pallas_call(
        functools.partial(_self_attn_kernel, num_heads=num_heads, d_k=d_k, d_v=d_v,
                          compute_dtype=compute_dtype),
        out_shape=jax.ShapeDtypeStruct((B, Tq, dv_total), jnp.float32),
        grid=(B,),
        in_specs=[
            pl.BlockSpec((1, Tq, C), lambda b: (b, 0, 0)),
            pl.BlockSpec((1, Tq, Tk), lambda b: (b, 0, 0)),
        ],
        out_specs=pl.BlockSpec((1, Tq, dv_total), lambda b: (b, 0, 0)),
        compiler_params=_compiler_params(),
    )(qkv, mask)


def cross_attention(q, kv, mask, *, num_heads, d_k, d_v, compute_dtype=COMPUTE_DTYPE):
    # q: (B, Tq, H*dk)   kv: (B, Tk, H*(dk+dv))   mask: (B, Tq, Tk)
    B, Tq, Cq = q.shape
    Tk = kv.shape[1]
    Ckv = kv.shape[2]
    dv_total = num_heads * d_v
    return pl.pallas_call(
        functools.partial(_cross_attn_kernel, num_heads=num_heads, d_k=d_k, d_v=d_v,
                          compute_dtype=compute_dtype),
        out_shape=jax.ShapeDtypeStruct((B, Tq, dv_total), jnp.float32),
        grid=(B,),
        in_specs=[
            pl.BlockSpec((1, Tq, Cq), lambda b: (b, 0, 0)),
            pl.BlockSpec((1, Tk, Ckv), lambda b: (b, 0, 0)),
            pl.BlockSpec((1, Tq, Tk), lambda b: (b, 0, 0)),
        ],
        out_specs=pl.BlockSpec((1, Tq, dv_total), lambda b: (b, 0, 0)),
        compiler_params=_compiler_params(),
    )(q, kv, mask)


# ------------------------------- model glue --------------------------------
# All reshapes below are (B, T, C) <-> (B*T, C) only: no data movement, no transposes.


def self_attn_sublayer(x, mask, p, *, compute_dtype=COMPUTE_DTYPE):
    B, T, D = x.shape
    H, dk, dv = p["num_heads"], p["d_k"], p["d_v"]
    xf = x.reshape(B * T, D)
    qkv = linear(xf, p["wqkv"], p["bqkv"], compute_dtype=compute_dtype)
    qkv = qkv.reshape(B, T, H * (2 * dk + dv))
    attn = self_attention(qkv, mask, num_heads=H, d_k=dk, d_v=dv,
                          compute_dtype=compute_dtype)
    attn = attn.reshape(B * T, H * dv)
    y = proj_residual_layernorm(attn, p["wo"], p["bo"], xf, p["ln_g"], p["ln_b"],
                                compute_dtype=compute_dtype)
    return y.reshape(B, T, D)


def cross_attn_sublayer(x, enc, mask, p, *, compute_dtype=COMPUTE_DTYPE):
    B, T, D = x.shape
    S = enc.shape[1]
    H, dk, dv = p["num_heads"], p["d_k"], p["d_v"]
    xf = x.reshape(B * T, D)
    ef = enc.reshape(B * S, D)
    q = linear(xf, p["wq"], p["bq"], compute_dtype=compute_dtype).reshape(B, T, H * dk)
    kv = linear(ef, p["wkv"], p["bkv"],
                compute_dtype=compute_dtype).reshape(B, S, H * (dk + dv))
    attn = cross_attention(q, kv, mask, num_heads=H, d_k=dk, d_v=dv,
                           compute_dtype=compute_dtype)
    attn = attn.reshape(B * T, H * dv)
    y = proj_residual_layernorm(attn, p["wo"], p["bo"], xf, p["ln_g"], p["ln_b"],
                                compute_dtype=compute_dtype)
    return y.reshape(B, T, D)


def ffn_sublayer(x, p, *, compute_dtype=COMPUTE_DTYPE):
    B, T, D = x.shape
    xf = x.reshape(B * T, D)
    y = ffn_residual_layernorm(xf, p["w1"], p["b1"], p["w2"], p["b2"],
                               p["ln_g"], p["ln_b"], compute_dtype=compute_dtype)
    return y.reshape(B, T, D)


def decoder_block(x, encodings, source_mask, target_mask, p):
    x = self_attn_sublayer(x, target_mask, p["self_attn"])
    x = cross_attn_sublayer(x, encodings, source_mask, p["src_attn"])
    x = ffn_sublayer(x, p["ffn"])
    return x


def transformer_decoder(targets, encodings, source_mask, target_mask, params):
    # Embedding lookup (gather) kept in plain JAX glue.
    x = jnp.take(params["emb"], targets, axis=0)          # (B, T, D)
    for p in params["blocks"]:
        x = decoder_block(x, encodings, source_mask, target_mask, p)
    return x
    # TODO(synk): TransformerDecoder.layer_norm exists in __init__ but is never
    # applied in the reference forward(), so it is intentionally not applied here.


# ---------------------------- parameter creation ---------------------------


def _init_self_attn(key, d_model, d_k, d_v, num_heads):
    ks = jax.random.split(key, 2)
    s = 0.02
    qkv_dim = num_heads * (2 * d_k + d_v)
    return {
        "num_heads": num_heads, "d_k": d_k, "d_v": d_v,
        "wqkv": s * jax.random.normal(ks[0], (d_model, qkv_dim), jnp.float32),
        "bqkv": jnp.zeros((1, qkv_dim), jnp.float32),
        "wo": s * jax.random.normal(ks[1], (num_heads * d_v, d_model), jnp.float32),
        "bo": jnp.zeros((1, d_model), jnp.float32),
        "ln_g": jnp.ones((1, d_model), jnp.float32),
        "ln_b": jnp.zeros((1, d_model), jnp.float32),
    }


def _init_cross_attn(key, d_model, d_k, d_v, num_heads):
    ks = jax.random.split(key, 3)
    s = 0.02
    return {
        "num_heads": num_heads, "d_k": d_k, "d_v": d_v,
        "wq": s * jax.random.normal(ks[0], (d_model, num_heads * d_k), jnp.float32),
        "bq": jnp.zeros((1, num_heads * d_k), jnp.float32),
        "wkv": s * jax.random.normal(ks[1], (d_model, num_heads * (d_k + d_v)),
                                     jnp.float32),
        "bkv": jnp.zeros((1, num_heads * (d_k + d_v)), jnp.float32),
        "wo": s * jax.random.normal(ks[2], (num_heads * d_v, d_model), jnp.float32),
        "bo": jnp.zeros((1, d_model), jnp.float32),
        "ln_g": jnp.ones((1, d_model), jnp.float32),
        "ln_b": jnp.zeros((1, d_model), jnp.float32),
    }


def _init_ffn(key, d_model, d_ff):
    k1, k2 = jax.random.split(key)
    s = 0.02
    return {
        "w1": s * jax.random.normal(k1, (d_model, d_ff), jnp.float32),
        "b1": jnp.zeros((1, d_ff), jnp.float32),
        "w2": s * jax.random.normal(k2, (d_ff, d_model), jnp.float32),
        "b2": jnp.zeros((1, d_model), jnp.float32),
        "ln_g": jnp.ones((1, d_model), jnp.float32),
        "ln_b": jnp.zeros((1, d_model), jnp.float32),
    }


def init_params(key, d_vocab, d_model, d_k, d_v, num_heads, d_ff, num_blocks):
    keys = jax.random.split(key, num_blocks * 3 + 1)
    params = {"emb": 0.02 * jax.random.normal(keys[0], (d_vocab, d_model),
                                              jnp.float32),
              "blocks": []}
    for i in range(num_blocks):
        params["blocks"].append({
            "self_attn": _init_self_attn(keys[1 + 3 * i], d_model, d_k, d_v, num_heads),
            "src_attn": _init_cross_attn(keys[2 + 3 * i], d_model, d_k, d_v, num_heads),
            "ffn": _init_ffn(keys[3 + 3 * i], d_model, d_ff),
        })
    return params


# ----------------------------------- main -----------------------------------

if __name__ == "__main__":
    B, T, S = 2, 8, 8
    D_MODEL, N_HEAD, D_K, D_V = 32, 4, 8, 8
    D_FF, N_BLOCKS, VOCAB = 64, 2, 50

    root = jax.random.PRNGKey(0)
    k_param, k_tgt, k_enc = jax.random.split(root, 3)

    params = init_params(k_param, VOCAB, D_MODEL, D_K, D_V, N_HEAD, D_FF, N_BLOCKS)

    targets = jax.random.randint(k_tgt, (B, T), 0, VOCAB, dtype=jnp.int32)
    encodings = jax.random.normal(k_enc, (B, S, D_MODEL), jnp.float32)
    # target mask: causal lower-triangular; source mask: all ones
    target_mask = jnp.tril(jnp.ones((T, T), jnp.float32))[None].repeat(B, axis=0)
    source_mask = jnp.ones((B, T, S), jnp.float32)

    out = transformer_decoder(targets, encodings, source_mask, target_mask, params)
    out = jax.block_until_ready(out)
    assert out.shape == (B, T, D_MODEL)
    assert jnp.all(jnp.isfinite(out))
    print("KERNEL_OK")
</pallas_src>

<mosaic_0001>
module attributes {stable_mosaic.version = 11 : i64} {
  func.func @_linear_kernel(%arg0: i32, %arg1: memref<16x32xf32, #tpu.memory_space<vmem>>, %arg2: memref<32x96xf32, #tpu.memory_space<vmem>>, %arg3: memref<1x96xf32, #tpu.memory_space<vmem>>, %arg4: memref<16x96xf32, #tpu.memory_space<vmem>>) attributes {dimension_semantics = [#tpu.dimension_semantics<parallel>], iteration_bounds = array<i64: 1>, scalar_prefetch = 0 : i64, scratch_operands = 0 : i64, tpu.core_type = #tpu.core_type<tc>, window_params = [{transform_indices = @transform_0, window_bounds = array<i64: 16, 32>}, {pipeline_mode = #tpu.pipeline_mode<synchronous>, transform_indices = @transform_1, window_bounds = array<i64: 32, 96>}, {pipeline_mode = #tpu.pipeline_mode<synchronous>, transform_indices = @transform_2, window_bounds = array<i64: 1, 96>}, {transform_indices = @transform_3, window_bounds = array<i64: 16, 96>}]} {
    %c0 = arith.constant 0 : index
    %c0_0 = arith.constant 0 : index
    %0 = vector.load %arg1[%c0, %c0_0] : memref<16x32xf32, #tpu.memory_space<vmem>>, vector<16x32xf32>
    %c0_1 = arith.constant 0 : index
    %c0_2 = arith.constant 0 : index
    %1 = vector.load %arg2[%c0_1, %c0_2] : memref<32x96xf32, #tpu.memory_space<vmem>>, vector<32x96xf32>
    %cst = arith.constant dense<0.000000e+00> : vector<16x96xf32>
    %2 = tpu.matmul %0, %1, %cst {dimension_numbers = #tpu.dot_dimension_numbers<[1], [0], [0], [1], [0, 0, 1, 1], [], []>} : vector<16x32xf32>, vector<32x96xf32>, vector<16x96xf32> -> vector<16x96xf32>
    %c0_3 = arith.constant 0 : index
    %c0_4 = arith.constant 0 : index
    %3 = vector.load %arg3[%c0_3, %c0_4] : memref<1x96xf32, #tpu.memory_space<vmem>>, vector<1x96xf32>
    %4 = vector.broadcast %3 : vector<1x96xf32> to vector<16x96xf32>
    %5 = arith.addf %2, %4 : vector<16x96xf32>
    %c0_5 = arith.constant 0 : index
    %c0_6 = arith.constant 0 : index
    %6 = vector.load %arg4[%c0_5, %c0_6] : memref<16x96xf32, #tpu.memory_space<vmem>>, vector<16x96xf32>
    tpu.vector_store %arg4[%c0_5, %c0_6], %5 {strides = array<i32>} : memref<16x96xf32, #tpu.memory_space<vmem>>, vector<16x96xf32>,
    return
  }
  func.func @transform_0(%arg0: i32) -> (i32, i32) {
    %c0_i32 = arith.constant 0 : i32
    %c0_i32_0 = arith.constant 0 : i32
    return %arg0, %c0_i32 : i32, i32
  }
  func.func @transform_1(%arg0: i32) -> (i32, i32) {
    %c0_i32 = arith.constant 0 : i32
    %c0_i32_0 = arith.constant 0 : i32
    %c0_i32_1 = arith.constant 0 : i32
    return %c0_i32, %c0_i32_0 : i32, i32
  }
  func.func @transform_2(%arg0: i32) -> (i32, i32) {
    %c0_i32 = arith.constant 0 : i32
    %c0_i32_0 = arith.constant 0 : i32
    %c0_i32_1 = arith.constant 0 : i32
    return %c0_i32, %c0_i32_0 : i32, i32
  }
  func.func @transform_3(%arg0: i32) -> (i32, i32) {
    %c0_i32 = arith.constant 0 : i32
    %c0_i32_0 = arith.constant 0 : i32
    return %arg0, %c0_i32 : i32, i32
  }
}

</mosaic_0001>

<bundles_post_ra>
// kernel: tpu_custom_call.1
= control target key start
LH: loop header
LB: loop body
LE: loop exit
PB: predicated region body
PF: predicated region fallthrough
CT: control target
= control target key end

     0   :  { %8 = vsyncpa [#allocation3], 0  ;;  %s298_s0 = inlined_call_operand.hbm [shape: f32[16,32], index: 0, kind: input, shape index: {}]   ;;  %s299_s1 = inlined_call_operand.hbm [shape: f32[32,96], index: 1, kind: input, shape index: {}]   ;;  %s300_s2 = inlined_call_operand.vmem [shape: f32[1,96], index: 2, kind: input, shape index: {}]   ;;  %s301_s3 = inlined_call_operand.hbm [shape: f32[16,96], index: 3, kind: output, shape index: {}]  }
   0x1   :  { %9 = vsyncpa [#allocation6], 0 }
   0x2   :  { %10 = vsyncpa [#allocation4], 0  ;;  %s250_s12 = smov [#allocation2]  }
   0x3   :  { %s16_s13 = sshll.u32 %s250_s12, 4  ;;  %s17_s13 = int_to_ptr.vmem [resolvable:$true] %s16_s13 }
   0x4   :  { %s192_s14 = scalar_lea.vmem %s17_s13, 256  ;;  %p197_p1 = scmp.lt.s32.totalorder %s17_s13, %s17_s13 }
   0x5   :  { %p193_p0 = scmp.ne.s32.totalorder %s17_s13, %s192_s14  ;;  %p198_p2 = scmp.lt.s32.totalorder %s192_s14, %s192_s14 }
   0x7   :  { %p199_p3 = por %p198_p2, %p197_p1 }
   0x9   :  { %p200_p4 = pnand %p199_p3, %p193_p0 }
   0xb   :  { %203 = shalt.err (!%p200_p4)
}
   0xc   :  { %s251_s15 = smov 128   ;;  %s252_s16 = smov 8  }
   0xd   :  { %22 = dma.hbm_to_vmem [thread:$0]  %s298_s0, 256, %s17_s13, [#allocation3], %s251_s15, %s251_s15, %s252_s16  }
   0xe   :  { %s253_s19 = smov [#allocation5]  }
   0xf   :  { %s28_s20 = sshll.u32 %s253_s19, 4  ;;  %s29_s20 = int_to_ptr.vmem [resolvable:$true] %s28_s20 }
  0x10   :  { %s212_s21 = scalar_lea.vmem %s29_s20, 512  ;;  %p217_p6 = scmp.lt.s32.totalorder %s29_s20, %s29_s20 }
  0x11   :  { %p213_p5 = scmp.ne.s32.totalorder %s29_s20, %s212_s21  ;;  %p218_p7 = scmp.lt.s32.totalorder %s212_s21, %s212_s21 }
  0x13   :  { %p219_p8 = por %p218_p7, %p217_p6 }
  0x15   :  { %p220_p9 = pnand %p219_p8, %p213_p5 }
  0x17   :  { %223 = shalt.err (!%p220_p9)
}
  0x18   :  { %34 = dma.hbm_to_vmem [thread:$0]  %s299_s1, 512, %s29_s20, [#allocation6], %s251_s15, %s251_s15, %s252_s16  }
  0x19   :  { %244 = dma.done.wait [#allocation3], 256  }
  0x1a   :  { %245 = vsyncadd [#allocation3], 4294967040 }
  0x1b   :  { %246 = dma.done.wait [#allocation6], 512  }
  0x1c   :  { %247 = vsyncadd [#allocation6], 4294966784  ;;  %vm56_vm0 = vcmask 261120   ;;  %v48_v0 = vld [vmem:[#allocation5 + $0x18] sm:$0xff]  ;;  %v47_v1 = vld [vmem:[#allocation5 + $0x10] sm:$0xff]  ;;  %vm138_vm1 = vcmask 785408  }
  0x1d   :  { %168 = vmatprep.subr.mxu0 %v48_v0  ;;  %v43_v2 = vld [vmem:[#allocation2] sm:$0xff]  ;;  %v46_v3 = vld [vmem:[#allocation5 + $0x8] sm:$0xff]  ;;  %v45_v4 = vld [vmem:[#allocation5] sm:$0xff]  ;;  %s254_s24 = smov [#allocation7]  }
  0x1e   :  { %169 = vmatpush3.msra.mxu0 %v48_v0  ;;  %176 = vmatprep.mubr.msk.f32.mxu0 %vm56_vm0, %v43_v2  ;;  %v44_v5 = vld [vmem:[#allocation2 + $0x8] sm:$0xff]  ;;  %v159_v6 = vld [vmem:[%s300_s2] ss:$0 sm:$0xff]  ;;  %s146_s25 = sshll.u32 %s254_s24, 4  ;;  %s147_s25 = int_to_ptr.vmem [resolvable:$true] %s146_s25 }
  0x1f   :  { %170 = vmatprep.subr.mxu0 %v47_v1  ;;  %s224_s26 = scalar_lea.vmem %s147_s25, 256  ;;  %p229_p11 = scmp.lt.s32.totalorder %s147_s25, %s147_s25 }
  0x20   :  { %171 = vmatpush3.msra.mxu0 %v47_v1  ;;  %p225_p10 = scmp.ne.s32.totalorder %s147_s25, %s224_s26  ;;  %p230_p12 = scmp.lt.s32.totalorder %s224_s26, %s224_s26 }
  0x21   :  { %172 = vmatprep.subr.mxu0 %v46_v3 }
  0x22   :  { %173 = vmatpush3.msra.mxu0 %v46_v3  ;;  %p231_p13 = por %p230_p12, %p229_p11 }
  0x23   :  { %174 = vmatprep.subr.mxu0 %v45_v4 }
  0x24   :  { %175 = vmatpush3.msra.mxu0 %v45_v4  ;;  %p232_p0 = pnand %p231_p13, %p225_p10 }
  0x25   :  { %177 = vmatmul.mubr.msk.f32.vlgmr.msra.gmra.mxu0 %vm56_vm0, %v44_v5 }
  0xe5   :  { %v178_v7 = vpop.f32.mrf.mxu0 }
  0xe6   :  { %v135_v8 = vadd.f32 %v178_v7, %v159_v6 }
  0xe7   :  { %v129_v9 = vpop.f32.mrf.mxu0 }
  0xe8   :  { %v130_v10 = vadd.f32 %v159_v6, %v129_v9  ;;  %140 = vst.msk [vmem:[#allocation7 + $0x8] sm:$0xff] %vm138_vm1, %v135_v8 }
  0xea   :  { %139 = vst.msk [vmem:[#allocation7] sm:$0xff] %vm138_vm1, %v130_v10 }
  0xeb   :  { %235 = shalt.err (!%p232_p0)
}
  0xec   :  { %152 = dma.vmem_to_hbm [thread:$0]  %s147_s25, 256, %s301_s3, [#allocation4], %s251_s15, %s251_s15, %s252_s16  }
  0xed   :  { %248 = dma.done.wait [#allocation4], 256  }
  0xee   :  { %249 = vsyncadd [#allocation4], 4294967040 }
  0xef   :  { %156 = vsyncpa [#allocation3], 1 }
  0xf0   :  { %157 = vsyncpa [#allocation6], 1 }
  0xf1   :  { %158 = vsyncpa [#allocation4], 1 }

</bundles_post_ra>
